<compile_context>
chip_gen: v7x
topology: tpu7x:2x2x1
jax: 0.10.0
libtpu: 0.0.40
codegen_flags: <defaults>
</compile_context>

<pallas_src>
import functools
import math

import jax
import jax.numpy as jnp
from jax.experimental import pallas as pl
from jax.experimental.pallas import tpu as pltpu


def _pick_tile(dim, preferred):
    """Largest preferred tile that divides `dim`, else the full dim (legal block)."""
    for c in preferred:
        if c <= dim and dim % c == 0:
            return c
    return dim


def _nbytes(shape, dtype):
    return math.prod(shape) * jnp.dtype(dtype).itemsize


def _vmem_limit(pipelined_bytes, scratch_bytes):
    """Scoped-VMEM limit sized from the actual block shapes: 2x for double
    buffering of pipelined blocks + 50% headroom for in-kernel temporaries.
    Floored at 32 MiB (safe on every chip) and capped below v7x's 64 MiB
    physical VMEM."""
    est = int((2 * pipelined_bytes + scratch_bytes) * 1.5)
    return max(32 * 1024 * 1024, min(est, 56 * 1024 * 1024))


# --------------------------- Tiled linear (x @ Wt + b) ---------------------------
def _linear_kernel(x_ref, w_ref, b_ref, o_ref, acc_ref):
    kk = pl.program_id(2)

    @pl.when(kk == 0)
    def _init():
        acc_ref[...] = jnp.zeros(acc_ref.shape, dtype=acc_ref.dtype)

    acc_ref[...] += jnp.dot(x_ref[...], w_ref[...],
                            preferred_element_type=jnp.float32)

    @pl.when(kk == pl.num_programs(2) - 1)
    def _finalize():
        o_ref[...] = (acc_ref[...] + b_ref[...]).astype(o_ref.dtype)


def linear(x, w_t, b, *, tm=None, tn=None, tk=None):
    """x: (M, K); w_t: (K, N) pre-transposed; b: (N,). Returns (M, N)."""
    M, K = x.shape
    N = w_t.shape[1]
    tm = tm or _pick_tile(M, (512, 256, 128, 64, 32, 16, 8))
    tn = tn or _pick_tile(N, (512, 256, 128))
    tk = tk or _pick_tile(K, (512, 256, 128))
    grid = (M // tm, N // tn, K // tk)
    pipelined = (_nbytes((tm, tk), x.dtype) + _nbytes((tk, tn), w_t.dtype)
                 + _nbytes((1, tn), b.dtype) + _nbytes((tm, tn), x.dtype))
    scratch = _nbytes((tm, tn), jnp.float32)
    return pl.pallas_call(
        _linear_kernel,
        out_shape=jax.ShapeDtypeStruct((M, N), x.dtype),
        grid=grid,
        in_specs=[
            pl.BlockSpec((tm, tk), lambda i, j, k: (i, k)),
            pl.BlockSpec((tk, tn), lambda i, j, k: (k, j)),
            pl.BlockSpec((1, tn), lambda i, j, k: (0, j)),
        ],
        out_specs=pl.BlockSpec((tm, tn), lambda i, j, k: (i, j)),
        scratch_shapes=[pltpu.VMEM((tm, tn), jnp.float32)],
        compiler_params=pltpu.CompilerParams(
            dimension_semantics=("parallel", "parallel", "arbitrary"),
            vmem_limit_bytes=_vmem_limit(pipelined, scratch)),
    )(x, w_t, b.reshape(1, N))


# ---------------- Fused, N-tiled QKV projection (reads x once per N tile) --------
def _qkv_proj_kernel(x_ref, wq_ref, wk_ref, wv_ref, bq_ref, bk_ref, bv_ref,
                     q_ref, k_ref, v_ref, accq_ref, acck_ref, accv_ref):
    kk = pl.program_id(2)

    @pl.when(kk == 0)
    def _init():
        accq_ref[...] = jnp.zeros(accq_ref.shape, dtype=accq_ref.dtype)
        acck_ref[...] = jnp.zeros(acck_ref.shape, dtype=acck_ref.dtype)
        accv_ref[...] = jnp.zeros(accv_ref.shape, dtype=accv_ref.dtype)

    x = x_ref[...]
    accq_ref[...] += jnp.dot(x, wq_ref[...], preferred_element_type=jnp.float32)
    acck_ref[...] += jnp.dot(x, wk_ref[...], preferred_element_type=jnp.float32)
    accv_ref[...] += jnp.dot(x, wv_ref[...], preferred_element_type=jnp.float32)

    @pl.when(kk == pl.num_programs(2) - 1)
    def _finalize():
        q_ref[...] = (accq_ref[...] + bq_ref[...]).astype(q_ref.dtype)
        k_ref[...] = (acck_ref[...] + bk_ref[...]).astype(k_ref.dtype)
        v_ref[...] = (accv_ref[...] + bv_ref[...]).astype(v_ref.dtype)


def qkv_projection(x, wq_t, bq, wk_t, bk, wv_t, bv, *, tm=None, tn_kv=None, tk=None):
    """x: (M, hidden); w*_t: (hidden, D*). Returns (q, k, v) in (M, D*) layout.

    The middle grid axis walks the k/v output dim in tn_kv blocks (q in
    group*tn_kv blocks), keeping weight/output blocks small enough to
    double-buffer within the scoped VMEM budget at large hidden sizes."""
    M, K = x.shape
    dq, dkv = wq_t.shape[1], wk_t.shape[1]
    assert wv_t.shape[1] == dkv and dq % dkv == 0
    group = dq // dkv
    tm = tm or _pick_tile(M, (512, 256, 128, 64, 32, 16, 8))
    tk = tk or _pick_tile(K, (512, 256, 128))
    tn_kv = tn_kv or _pick_tile(dkv, (512, 256, 128))
    tn_q = tn_kv * group
    grid = (M // tm, dkv // tn_kv, K // tk)
    pipelined = (_nbytes((tm, tk), x.dtype)
                 + _nbytes((tk, tn_q + 2 * tn_kv), x.dtype)
                 + _nbytes((1, tn_q + 2 * tn_kv), x.dtype)
                 + _nbytes((tm, tn_q + 2 * tn_kv), x.dtype))
    scratch = _nbytes((tm, tn_q + 2 * tn_kv), jnp.float32)
    return pl.pallas_call(
        _qkv_proj_kernel,
        out_shape=(jax.ShapeDtypeStruct((M, dq), x.dtype),
                   jax.ShapeDtypeStruct((M, dkv), x.dtype),
                   jax.ShapeDtypeStruct((M, dkv), x.dtype)),
        grid=grid,
        in_specs=[
            pl.BlockSpec((tm, tk), lambda i, j, k: (i, k)),
            pl.BlockSpec((tk, tn_q), lambda i, j, k: (k, j)),
            pl.BlockSpec((tk, tn_kv), lambda i, j, k: (k, j)),
            pl.BlockSpec((tk, tn_kv), lambda i, j, k: (k, j)),
            pl.BlockSpec((1, tn_q), lambda i, j, k: (0, j)),
            pl.BlockSpec((1, tn_kv), lambda i, j, k: (0, j)),
            pl.BlockSpec((1, tn_kv), lambda i, j, k: (0, j)),
        ],
        out_specs=(pl.BlockSpec((tm, tn_q), lambda i, j, k: (i, j)),
                   pl.BlockSpec((tm, tn_kv), lambda i, j, k: (i, j)),
                   pl.BlockSpec((tm, tn_kv), lambda i, j, k: (i, j))),
        scratch_shapes=[pltpu.VMEM((tm, tn_q), jnp.float32),
                        pltpu.VMEM((tm, tn_kv), jnp.float32),
                        pltpu.VMEM((tm, tn_kv), jnp.float32)],
        compiler_params=pltpu.CompilerParams(
            dimension_semantics=("parallel", "parallel", "arbitrary"),
            vmem_limit_bytes=_vmem_limit(pipelined, scratch)),
    )(x, wq_t, wk_t, wv_t,
      bq.reshape(1, dq), bk.reshape(1, dkv), bv.reshape(1, dkv))


# ------------------- GQA flash attention (non-causal, online softmax) ------------
def _flash_attn_kernel(q_ref, k_ref, v_ref, o_ref,
                       qs_ref, m_ref, l_ref, acc_ref, *,
                       heads, heads_k, head_dim):
    # q_ref: (tq, H*D)   k_ref/v_ref: (tkv, Hk*D)   o_ref: (tq, H*D)
    # qs_ref: (Hk, group*tq, D)  restacked q (input dtype, filled at kv_step 0)
    # m_ref/l_ref: (group*tq, Hk) f32   running max / denom, lane-packed
    # acc_ref: (Hk, group*tq, D) f32    unnormalized output in the stacked layout
    kv_step = pl.program_id(2)
    group = heads // heads_k
    tq = q_ref.shape[0]
    D = head_dim

    @pl.when(kv_step == 0)
    def _init():
        m_ref[...] = jnp.full(m_ref.shape, -jnp.inf, dtype=m_ref.dtype)
        l_ref[...] = jnp.zeros(l_ref.shape, dtype=l_ref.dtype)
        acc_ref[...] = jnp.zeros(acc_ref.shape, dtype=acc_ref.dtype)
        # Restack the packed (tq, H*D) q tile into per-kv-head (group*tq, D)
        # blocks once per q tile; reused unchanged for every kv step.
        for hk in range(heads_k):
            for g in range(group):
                h = hk * group + g
                qs_ref[hk, g * tq:(g + 1) * tq, :] = q_ref[:, h * D:(h + 1) * D]

    # One K/V tile load per kv head, shared by all `group` query heads; one
    # tall QK matmul and one PV matmul per kv head (MXU pushes cut by group).
    for hk in range(heads_k):
        k_h = k_ref[:, hk * D:(hk + 1) * D]                        # (tkv, D)
        v_h = v_ref[:, hk * D:(hk + 1) * D]                        # (tkv, D)
        q_blk = qs_ref[hk]                                         # (group*tq, D)
        # Contract last-vs-last dims: K is never transposed.
        s = jax.lax.dot_general(q_blk, k_h, (((1,), (1,)), ((), ())),
                                preferred_element_type=jnp.float32)  # (group*tq, tkv)
        m_prev = m_ref[:, hk:hk + 1]                               # (group*tq, 1)
        m_new = jnp.maximum(m_prev, s.max(axis=-1, keepdims=True))
        alpha = jnp.exp(m_prev - m_new)
        p = jnp.exp(s - m_new)
        l_ref[:, hk:hk + 1] = alpha * l_ref[:, hk:hk + 1] + p.sum(axis=-1, keepdims=True)
        acc_ref[hk] = alpha * acc_ref[hk] + jnp.dot(
            p.astype(v_h.dtype), v_h, preferred_element_type=jnp.float32)
        m_ref[:, hk:hk + 1] = m_new

    @pl.when(kv_step == pl.num_programs(2) - 1)
    def _finalize():
        inv_l = pl.reciprocal(l_ref[...], approx=True)             # all heads, one EUP pass
        for hk in range(heads_k):
            out_blk = (acc_ref[hk] * inv_l[:, hk:hk + 1]).astype(o_ref.dtype)
            for g in range(group):
                h = hk * group + g
                o_ref[:, h * D:(h + 1) * D] = out_blk[g * tq:(g + 1) * tq, :]


def flash_attention(q, k, v, *, heads, heads_k, head_dim, tq=None, tkv=None):
    """q: (B, S, H*D); k, v: (B, S, Hk*D). Returns (B, S, H*D), lane-dense.

    The softmax scale must already be folded into q (done in the q projection
    weights), so the kernel never rescales."""
    B, S, dq = q.shape
    dkv = k.shape[-1]
    assert dq == heads * head_dim and dkv == heads_k * head_dim
    assert heads % heads_k == 0
    group = heads // heads_k
    # tq=256 is safe on every chip (acc / restacked-q scratch scale with tq and
    # v7x only has 64 MiB VMEM); on v5e/v6e pass tq=512 to halve KV HBM refetch.
    tq = tq or _pick_tile(S, (256, 128, 64, 32, 16, 8))
    tkv = tkv or _pick_tile(S, (256, 128, 64, 32, 16, 8))
    grid = (B, S // tq, S // tkv)
    kernel = functools.partial(_flash_attn_kernel, heads=heads, heads_k=heads_k,
                               head_dim=head_dim)
    pipelined = (2 * _nbytes((tq, dq), q.dtype) + 2 * _nbytes((tkv, dkv), k.dtype))
    scratch = (_nbytes((heads_k, group * tq, head_dim), q.dtype)
               + 2 * _nbytes((group * tq, 128), jnp.float32)
               + _nbytes((heads_k, group * tq, head_dim), jnp.float32))
    return pl.pallas_call(
        kernel,
        out_shape=jax.ShapeDtypeStruct((B, S, dq), q.dtype),
        grid=grid,
        in_specs=[
            pl.BlockSpec((None, tq, dq), lambda b, qi, ki: (b, qi, 0)),
            pl.BlockSpec((None, tkv, dkv), lambda b, qi, ki: (b, ki, 0)),
            pl.BlockSpec((None, tkv, dkv), lambda b, qi, ki: (b, ki, 0)),
        ],
        out_specs=pl.BlockSpec((None, tq, dq), lambda b, qi, ki: (b, qi, 0)),
        scratch_shapes=[
            pltpu.VMEM((heads_k, group * tq, head_dim), q.dtype),     # restacked q
            pltpu.VMEM((group * tq, heads_k), jnp.float32),           # running max m
            pltpu.VMEM((group * tq, heads_k), jnp.float32),           # running denom l
            pltpu.VMEM((heads_k, group * tq, head_dim), jnp.float32), # unnormalized out
        ],
        compiler_params=pltpu.CompilerParams(
            dimension_semantics=("parallel", "parallel", "arbitrary"),
            vmem_limit_bytes=_vmem_limit(pipelined, scratch)),
    )(q, k, v)


# ----------------------------------- Forward -------------------------------------
def attention_layer_forward(h, params, *, heads, heads_k):
    """h: (B, S, hidden) -> (B*S, hidden), matching the PyTorch module."""
    B, S, hidden = h.shape
    head_dim = hidden // heads
    scale = 1.0 / math.sqrt(head_dim)

    # Fold the softmax 1/sqrt(D) into the q projection weights + bias (free; in
    # a real model this is done once at parameter-load time), so the attention
    # kernel never rescales q.
    wq_t = params["wq_t"] * scale
    bq = params["bq"] * scale

    h2 = h.reshape(B * S, hidden)
    q, k, v = qkv_projection(h2, wq_t, bq,
                             params["wk_t"], params["bk"],
                             params["wv_t"], params["bv"])

    # Free reshapes only (no transposes): stay in lane-dense (B, S, features).
    q = q.reshape(B, S, heads * head_dim)
    k = k.reshape(B, S, heads_k * head_dim)
    v = v.reshape(B, S, heads_k * head_dim)

    o = flash_attention(q, k, v, heads=heads, heads_k=heads_k, head_dim=head_dim)
    o = o.reshape(B * S, hidden)

    return linear(o, params["wo_t"], params["bo"])               # (B*S, hidden)


# ----------------------------- Pure-JAX reference ---------------------------------
def _reference(h, p, *, heads, heads_k):
    B, S, hidden = h.shape
    D = hidden // heads
    group = heads // heads_k
    h2 = h.reshape(B * S, hidden)
    q = (h2 @ p["wq_t"] + p["bq"]).reshape(B, S, heads, D)
    k = (h2 @ p["wk_t"] + p["bk"]).reshape(B, S, heads_k, D)
    v = (h2 @ p["wv_t"] + p["bv"]).reshape(B, S, heads_k, D)
    k = jnp.repeat(k, group, axis=2)
    v = jnp.repeat(v, group, axis=2)
    s = jnp.einsum("bqhd,bkhd->bhqk", q, k) / math.sqrt(D)
    w = jax.nn.softmax(s, axis=-1)
    o = jnp.einsum("bhqk,bkhd->bqhd", w, v).reshape(B * S, hidden)
    return o @ p["wo_t"] + p["bo"]


# ------------------------------------- Main ---------------------------------------
if __name__ == "__main__":
    B, S, hidden = 2, 8, 32
    heads, heads_k = 4, 2
    head_dim = hidden // heads  # 8

    key = jax.random.PRNGKey(0)
    ks = jax.random.split(key, 9)
    init = lambda k_, shape: jax.random.normal(k_, shape, jnp.float32) * 0.05

    # Torch-style (out, in) weights; transposed ONCE at parameter-load time.
    wq = init(ks[0], (heads * head_dim, hidden))
    bq = init(ks[1], (heads * head_dim,))
    wk = init(ks[2], (heads_k * head_dim, hidden))
    bk = init(ks[3], (heads_k * head_dim,))
    wv = init(ks[4], (heads_k * head_dim, hidden))
    bv = init(ks[5], (heads_k * head_dim,))
    wo = init(ks[6], (hidden, hidden))
    bo = init(ks[7], (hidden,))

    params = {
        "wq_t": wq.T, "bq": bq,
        "wk_t": wk.T, "bk": bk,
        "wv_t": wv.T, "bv": bv,
        "wo_t": wo.T, "bo": bo,
    }

    h = jax.random.normal(ks[8], (B, S, hidden), jnp.float32)

    out = attention_layer_forward(h, params, heads=heads, heads_k=heads_k)
    out = jax.block_until_ready(out)
    assert out.shape == (B * S, hidden), out.shape

    ref = _reference(h, params, heads=heads, heads_k=heads_k)
    max_err = float(jnp.max(jnp.abs(out - ref)))
    assert jnp.allclose(out, ref, atol=3e-2, rtol=3e-2), max_err

    print("KERNEL_OK")
</pallas_src>

<mosaic_0001>
module attributes {stable_mosaic.version = 11 : i64} {
  func.func @_qkv_proj_kernel(%arg0: i32, %arg1: i32, %arg2: i32, %arg3: memref<16x32xf32, #tpu.memory_space<vmem>>, %arg4: memref<32x32xf32, #tpu.memory_space<vmem>>, %arg5: memref<32x16xf32, #tpu.memory_space<vmem>>, %arg6: memref<32x16xf32, #tpu.memory_space<vmem>>, %arg7: memref<1x32xf32, #tpu.memory_space<vmem>>, %arg8: memref<1x16xf32, #tpu.memory_space<vmem>>, %arg9: memref<1x16xf32, #tpu.memory_space<vmem>>, %arg10: memref<16x32xf32, #tpu.memory_space<vmem>>, %arg11: memref<16x16xf32, #tpu.memory_space<vmem>>, %arg12: memref<16x16xf32, #tpu.memory_space<vmem>>, %arg13: memref<16x32xf32, #tpu.memory_space<vmem>>, %arg14: memref<16x16xf32, #tpu.memory_space<vmem>>, %arg15: memref<16x16xf32, #tpu.memory_space<vmem>>) attributes {dimension_semantics = [#tpu.dimension_semantics<parallel>, #tpu.dimension_semantics<parallel>, #tpu.dimension_semantics<arbitrary>], iteration_bounds = array<i64: 1, 1, 1>, scalar_prefetch = 0 : i64, scratch_operands = 3 : i64, tpu.core_type = #tpu.core_type<tc>, window_params = [{transform_indices = @transform_0, window_bounds = array<i64: 16, 32>}, {transform_indices = @transform_1, window_bounds = array<i64: 32, 32>}, {transform_indices = @transform_2, window_bounds = array<i64: 32, 16>}, {transform_indices = @transform_3, window_bounds = array<i64: 32, 16>}, {transform_indices = @transform_4, window_bounds = array<i64: 1, 32>}, {transform_indices = @transform_5, window_bounds = array<i64: 1, 16>}, {transform_indices = @transform_6, window_bounds = array<i64: 1, 16>}, {transform_indices = @transform_7, window_bounds = array<i64: 16, 32>}, {transform_indices = @transform_8, window_bounds = array<i64: 16, 16>}, {transform_indices = @transform_9, window_bounds = array<i64: 16, 16>}]} {
    %c0_i32 = arith.constant 0 : i32
    %0 = arith.cmpi eq, %arg2, %c0_i32 : i32
    %1 = arith.extui %0 : i1 to i32
    %c0_i32_0 = arith.constant 0 : i32
    %2 = arith.cmpi ne, %1, %c0_i32_0 : i32
    scf.if %2 {
      %cst_24 = arith.constant 0.000000e+00 : f32
      %22 = vector.broadcast %cst_24 : f32 to vector<16x32xf32>
      %c0_25 = arith.constant 0 : index
      %c0_26 = arith.constant 0 : index
      %23 = vector.load %arg13[%c0_25, %c0_26] : memref<16x32xf32, #tpu.memory_space<vmem>>, vector<16x32xf32>
      tpu.vector_store %arg13[%c0_25, %c0_26], %22 {strides = array<i32>} : memref<16x32xf32, #tpu.memory_space<vmem>>, vector<16x32xf32>,
      %cst_27 = arith.constant 0.000000e+00 : f32
      %24 = vector.broadcast %cst_27 : f32 to vector<16x16xf32>
      %c0_28 = arith.constant 0 : index
      %c0_29 = arith.constant 0 : index
      %25 = vector.load %arg14[%c0_28, %c0_29] : memref<16x16xf32, #tpu.memory_space<vmem>>, vector<16x16xf32>
      tpu.vector_store %arg14[%c0_28, %c0_29], %24 {strides = array<i32>} : memref<16x16xf32, #tpu.memory_space<vmem>>, vector<16x16xf32>,
      %cst_30 = arith.constant 0.000000e+00 : f32
      %26 = vector.broadcast %cst_30 : f32 to vector<16x16xf32>
      %c0_31 = arith.constant 0 : index
      %c0_32 = arith.constant 0 : index
      %27 = vector.load %arg15[%c0_31, %c0_32] : memref<16x16xf32, #tpu.memory_space<vmem>>, vector<16x16xf32>
      tpu.vector_store %arg15[%c0_31, %c0_32], %26 {strides = array<i32>} : memref<16x16xf32, #tpu.memory_space<vmem>>, vector<16x16xf32>,
    } else {
    }
    %c0 = arith.constant 0 : index
    %c0_1 = arith.constant 0 : index
    %3 = vector.load %arg3[%c0, %c0_1] : memref<16x32xf32, #tpu.memory_space<vmem>>, vector<16x32xf32>
    %c0_2 = arith.constant 0 : index
    %c0_3 = arith.constant 0 : index
    %4 = vector.load %arg13[%c0_2, %c0_3] : memref<16x32xf32, #tpu.memory_space<vmem>>, vector<16x32xf32>
    %c0_4 = arith.constant 0 : index
    %c0_5 = arith.constant 0 : index
    %5 = vector.load %arg4[%c0_4, %c0_5] : memref<32x32xf32, #tpu.memory_space<vmem>>, vector<32x32xf32>
    %cst = arith.constant dense<0.000000e+00> : vector<16x32xf32>
    %6 = tpu.matmul %3, %5, %cst {dimension_numbers = #tpu.dot_dimension_numbers<[1], [0], [0], [1], [0, 0, 1, 1], [], []>} : vector<16x32xf32>, vector<32x32xf32>, vector<16x32xf32> -> vector<16x32xf32>
    %7 = arith.addf %4, %6 : vector<16x32xf32>
    %c0_6 = arith.constant 0 : index
    %c0_7 = arith.constant 0 : index
    %8 = vector.load %arg13[%c0_6, %c0_7] : memref<16x32xf32, #tpu.memory_space<vmem>>, vector<16x32xf32>
    tpu.vector_store %arg13[%c0_6, %c0_7], %7 {strides = array<i32>} : memref<16x32xf32, #tpu.memory_space<vmem>>, vector<16x32xf32>,
    %c0_8 = arith.constant 0 : index
    %c0_9 = arith.constant 0 : index
    %9 = vector.load %arg14[%c0_8, %c0_9] : memref<16x16xf32, #tpu.memory_space<vmem>>, vector<16x16xf32>
    %c0_10 = arith.constant 0 : index
    %c0_11 = arith.constant 0 : index
    %10 = vector.load %arg5[%c0_10, %c0_11] : memref<32x16xf32, #tpu.memory_space<vmem>>, vector<32x16xf32>
    %cst_12 = arith.constant dense<0.000000e+00> : vector<16x16xf32>
    %11 = tpu.matmul %3, %10, %cst_12 {dimension_numbers = #tpu.dot_dimension_numbers<[1], [0], [0], [1], [0, 0, 1, 1], [], []>} : vector<16x32xf32>, vector<32x16xf32>, vector<16x16xf32> -> vector<16x16xf32>
    %12 = arith.addf %9, %11 : vector<16x16xf32>
    %c0_13 = arith.constant 0 : index
    %c0_14 = arith.constant 0 : index
    %13 = vector.load %arg14[%c0_13, %c0_14] : memref<16x16xf32, #tpu.memory_space<vmem>>, vector<16x16xf32>
    tpu.vector_store %arg14[%c0_13, %c0_14], %12 {strides = array<i32>} : memref<16x16xf32, #tpu.memory_space<vmem>>, vector<16x16xf32>,
    %c0_15 = arith.constant 0 : index
    %c0_16 = arith.constant 0 : index
    %14 = vector.load %arg15[%c0_15, %c0_16] : memref<16x16xf32, #tpu.memory_space<vmem>>, vector<16x16xf32>
    %c0_17 = arith.constant 0 : index
    %c0_18 = arith.constant 0 : index
    %15 = vector.load %arg6[%c0_17, %c0_18] : memref<32x16xf32, #tpu.memory_space<vmem>>, vector<32x16xf32>
    %cst_19 = arith.constant dense<0.000000e+00> : vector<16x16xf32>
    %16 = tpu.matmul %3, %15, %cst_19 {dimension_numbers = #tpu.dot_dimension_numbers<[1], [0], [0], [1], [0, 0, 1, 1], [], []>} : vector<16x32xf32>, vector<32x16xf32>, vector<16x16xf32> -> vector<16x16xf32>
    %17 = arith.addf %14, %16 : vector<16x16xf32>
    %c0_20 = arith.constant 0 : index
    %c0_21 = arith.constant 0 : index
    %18 = vector.load %arg15[%c0_20, %c0_21] : memref<16x16xf32, #tpu.memory_space<vmem>>, vector<16x16xf32>
    tpu.vector_store %arg15[%c0_20, %c0_21], %17 {strides = array<i32>} : memref<16x16xf32, #tpu.memory_space<vmem>>, vector<16x16xf32>,
    %c0_i32_22 = arith.constant 0 : i32
    %19 = arith.cmpi eq, %arg2, %c0_i32_22 : i32
    %20 = arith.extui %19 : i1 to i32
    %c0_i32_23 = arith.constant 0 : i32
    %21 = arith.cmpi ne, %20, %c0_i32_23 : i32
    scf.if %21 {
      %c0_24 = arith.constant 0 : index
      %c0_25 = arith.constant 0 : index
      %22 = vector.load %arg13[%c0_24, %c0_25] : memref<16x32xf32, #tpu.memory_space<vmem>>, vector<16x32xf32>
      %c0_26 = arith.constant 0 : index
      %c0_27 = arith.constant 0 : index
      %23 = vector.load %arg7[%c0_26, %c0_27] : memref<1x32xf32, #tpu.memory_space<vmem>>, vector<1x32xf32>
      %24 = vector.broadcast %23 : vector<1x32xf32> to vector<16x32xf32>
      %25 = arith.addf %22, %24 : vector<16x32xf32>
      %c0_28 = arith.constant 0 : index
      %c0_29 = arith.constant 0 : index
      %26 = vector.load %arg10[%c0_28, %c0_29] : memref<16x32xf32, #tpu.memory_space<vmem>>, vector<16x32xf32>
      tpu.vector_store %arg10[%c0_28, %c0_29], %25 {strides = array<i32>} : memref<16x32xf32, #tpu.memory_space<vmem>>, vector<16x32xf32>,
      %c0_30 = arith.constant 0 : index
      %c0_31 = arith.constant 0 : index
      %27 = vector.load %arg14[%c0_30, %c0_31] : memref<16x16xf32, #tpu.memory_space<vmem>>, vector<16x16xf32>
      %c0_32 = arith.constant 0 : index
      %c0_33 = arith.constant 0 : index
      %28 = vector.load %arg8[%c0_32, %c0_33] : memref<1x16xf32, #tpu.memory_space<vmem>>, vector<1x16xf32>
      %29 = vector.broadcast %28 : vector<1x16xf32> to vector<16x16xf32>
      %30 = arith.addf %27, %29 : vector<16x16xf32>
      %c0_34 = arith.constant 0 : index
      %c0_35 = arith.constant 0 : index
      %31 = vector.load %arg11[%c0_34, %c0_35] : memref<16x16xf32, #tpu.memory_space<vmem>>, vector<16x16xf32>
      tpu.vector_store %arg11[%c0_34, %c0_35], %30 {strides = array<i32>} : memref<16x16xf32, #tpu.memory_space<vmem>>, vector<16x16xf32>,
      %c0_36 = arith.constant 0 : index
      %c0_37 = arith.constant 0 : index
      %32 = vector.load %arg15[%c0_36, %c0_37] : memref<16x16xf32, #tpu.memory_space<vmem>>, vector<16x16xf32>
      %c0_38 = arith.constant 0 : index
      %c0_39 = arith.constant 0 : index
      %33 = vector.load %arg9[%c0_38, %c0_39] : memref<1x16xf32, #tpu.memory_space<vmem>>, vector<1x16xf32>
      %34 = vector.broadcast %33 : vector<1x16xf32> to vector<16x16xf32>
      %35 = arith.addf %32, %34 : vector<16x16xf32>
      %c0_40 = arith.constant 0 : index
      %c0_41 = arith.constant 0 : index
      %36 = vector.load %arg12[%c0_40, %c0_41] : memref<16x16xf32, #tpu.memory_space<vmem>>, vector<16x16xf32>
      tpu.vector_store %arg12[%c0_40, %c0_41], %35 {strides = array<i32>} : memref<16x16xf32, #tpu.memory_space<vmem>>, vector<16x16xf32>,
    } else {
    }
    return
  }
  func.func @transform_0(%arg0: i32, %arg1: i32, %arg2: i32) -> (i32, i32) {
    %c0_i32 = arith.constant 0 : i32
    return %arg0, %arg2 : i32, i32
  }
  func.func @transform_1(%arg0: i32, %arg1: i32, %arg2: i32) -> (i32, i32) {
    %c0_i32 = arith.constant 0 : i32
    return %arg2, %arg1 : i32, i32
  }
  func.func @transform_2(%arg0: i32, %arg1: i32, %arg2: i32) -> (i32, i32) {
    %c0_i32 = arith.constant 0 : i32
    return %arg2, %arg1 : i32, i32
  }
  func.func @transform_3(%arg0: i32, %arg1: i32, %arg2: i32) -> (i32, i32) {
    %c0_i32 = arith.constant 0 : i32
    return %arg2, %arg1 : i32, i32
  }
  func.func @transform_4(%arg0: i32, %arg1: i32, %arg2: i32) -> (i32, i32) {
    %c0_i32 = arith.constant 0 : i32
    %c0_i32_0 = arith.constant 0 : i32
    return %c0_i32, %arg1 : i32, i32
  }
  func.func @transform_5(%arg0: i32, %arg1: i32, %arg2: i32) -> (i32, i32) {
    %c0_i32 = arith.constant 0 : i32
    %c0_i32_0 = arith.constant 0 : i32
    return %c0_i32, %arg1 : i32, i32
  }
  func.func @transform_6(%arg0: i32, %arg1: i32, %arg2: i32) -> (i32, i32) {
    %c0_i32 = arith.constant 0 : i32
    %c0_i32_0 = arith.constant 0 : i32
    return %c0_i32, %arg1 : i32, i32
  }
  func.func @transform_7(%arg0: i32, %arg1: i32, %arg2: i32) -> (i32, i32) {
    %c0_i32 = arith.constant 0 : i32
    return %arg0, %arg1 : i32, i32
  }
  func.func @transform_8(%arg0: i32, %arg1: i32, %arg2: i32) -> (i32, i32) {
    %c0_i32 = arith.constant 0 : i32
    return %arg0, %arg1 : i32, i32
  }
  func.func @transform_9(%arg0: i32, %arg1: i32, %arg2: i32) -> (i32, i32) {
    %c0_i32 = arith.constant 0 : i32
    return %arg0, %arg1 : i32, i32
  }
}

</mosaic_0001>

<bundles_post_ra>
// kernel: tpu_custom_call.1
= control target key start
LH: loop header
LB: loop body
LE: loop exit
PB: predicated region body
PF: predicated region fallthrough
CT: control target
= control target key end

     0   :  { %15 = vsyncpa [#allocation6], 0  ;;  %vm35_vm0 = vcmask 261120   ;;  %v557_v7 = vmov 0.0   ;;  %s740_s0 = inlined_call_operand.vmem [shape: f32[16,32], index: 0, kind: input, shape index: {}]   ;;  %s741_s1 = inlined_call_operand.vmem [shape: f32[32,32], index: 1, kind: input, shape index: {}]   ;;  %s742_s2 = inlined_call_operand.vmem [shape: f32[32,16], index: 2, kind: input, shape index: {}]   ;;  %s743_s3 = inlined_call_operand.vmem [shape: f32[32,16], index: 3, kind: input, shape index: {}]   ;;  %s744_s4 = inlined_call_operand.vmem [shape: f32[1,32], index: 4, kind: input, shape index: {}]   ;;  %s745_s5 = inlined_call_operand.vmem [shape: f32[1,16], index: 5, kind: input, shape index: {}]   ;;  %s746_s6 = inlined_call_operand.vmem [shape: f32[1,16], index: 6, kind: input, shape index: {}]   ;;  %s747_s7 = inlined_call_operand.hbm [shape: f32[16,32], index: 7, kind: output, shape index: {0}]   ;;  %s748_s8 = inlined_call_operand.hbm [shape: f32[16,16], index: 8, kind: output, shape index: {1}]   ;;  %s749_s9 = inlined_call_operand.hbm [shape: f32[16,16], index: 9, kind: output, shape index: {2}]  }
   0x1   :  { %v47_v0 = vld [vmem:[%s741_s1] sm:$0xff]  ;;  %v48_v1 = vld [vmem:[%s741_s1 + $0x8] sm:$0xff]  ;;  %v49_v2 = vld [vmem:[%s741_s1 + $0x10] sm:$0xff]  ;;  %37 = vst.msk [vmem:[#allocation2 + $0x8] sm:$0xff] %vm35_vm0, %v557_v7 }
   0x2   :  { %v457_v3 = vpack.c.bf16 %v48_v1, %v47_v0  ;;  %v50_v4 = vld [vmem:[%s741_s1 + $0x18] sm:$0xff]  ;;  %v139_v5 = vld [vmem:[%s742_s2] sm:$0xff]  ;;  %v140_v6 = vld [vmem:[%s742_s2 + $0x8] sm:$0xff]  ;;  %36 = vst.msk [vmem:[#allocation2] sm:$0xff] %vm35_vm0, %v557_v7 }
   0x3   :  { %v461_v8 = vpack.c.bf16 %v50_v4, %v49_v2  ;;  %v465_v9 = vpack.c.bf16 %v140_v6, %v139_v5  ;;  %v43_v10 = vld [vmem:[%s740_s0] sm:$0xff]  ;;  %v226_v12 = vld [vmem:[%s743_s3 + $0x8] sm:$0xff]  ;;  %v141_v13 = vld [vmem:[%s742_s2 + $0x10] sm:$0xff] }
   0x4   :  { %v225_v11 = vld [vmem:[%s743_s3] sm:$0xff]  ;;  %458 = vmatprep.subr.bf16.mxu0 %v457_v3  ;;  %432 = vmatprep.mubr.msk.f32.mxu0 %vm35_vm0, %v43_v10  ;;  %v142_v14 = vld [vmem:[%s742_s2 + $0x18] sm:$0xff] }
   0x5   :  { %460 = vmatpush3.bf16.msra.mxu0 %v457_v3  ;;  %466 = vmatprep.subr.bf16.mxu1 %v465_v9  ;;  %v469_v15 = vpack.c.bf16 %v142_v14, %v141_v13 }
   0x6   :  { %16 = vsyncpa [#allocation8], 0  ;;  %462 = vmatprep.subr.bf16.mxu0 %v461_v8  ;;  %468 = vmatpush3.bf16.msra.mxu1 %v465_v9  ;;  %v473_v16 = vpack.c.bf16 %v226_v12, %v225_v11  ;;  %v227_v17 = vld [vmem:[%s743_s3 + $0x10] sm:$0xff]  ;;  %v228_v18 = vld [vmem:[%s743_s3 + $0x18] sm:$0xff]  ;;  %vm38_vm1 = vcmask 130048   ;;  %s558_s16 = smov [#allocation5]  }
   0x7   :  { %470 = vmatprep.subr.bf16.mxu1 %v469_v15  ;;  %443 = vmatprep.mubr.msk.f32.mxu1 %vm35_vm0, %v43_v10  ;;  %v44_v19 = vld [vmem:[%s740_s0 + $0x8] sm:$0xff]  ;;  %v477_v20 = vpack.c.bf16 %v228_v18, %v227_v17  ;;  %40 = vst.msk [vmem:[#allocation3 + $0x8] sm:$0xff] %vm38_vm1, %v557_v7  ;;  %39 = vst.msk [vmem:[#allocation3] sm:$0xff] %vm38_vm1, %v557_v7  ;;  %v403_v36 = vld [vmem:[%s744_s4] ss:$0 sm:$0xff]  ;;  %s355_s17 = sshll.u32 %s558_s16, 4  ;;  %s356_s17 = int_to_ptr.vmem [resolvable:$true] %s355_s17 }
   0x8   :  { %41 = vst.msk [vmem:[#allocation4] sm:$0xff] %vm38_vm1, %v557_v7  ;;  %42 = vst.msk [vmem:[#allocation4 + $0x8] sm:$0xff] %vm38_vm1, %v557_v7  ;;  %v46_v21 = vld [vmem:[#allocation2 + $0x8] sm:$0xff]  ;;  %v404_v39 = vld [vmem:[%s745_s5] ss:$0 sm:$0xff]  ;;  %s559_s18 = smov [#allocation7]   ;;  %p492_p1 = scmp.lt.s32.totalorder %s356_s17, %s356_s17 }
   0x9   :  { %464 = vmatpush3.bf16.msra.mxu0 %v461_v8  ;;  %v45_v22 = vld [vmem:[#allocation2] sm:$0xff]  ;;  %s367_s19 = sshll.u32 %s559_s18, 4  ;;  %s487_s20 = scalar_lea.vmem %s356_s17, 256  ;;  %s679_s19 = int_to_ptr.vmem [resolvable:$true] %s367_s19 }
   0xa   :  { %474 = vmatprep.subr.bf16.mxu0 %v473_v16  ;;  %472 = vmatpush3.bf16.msra.mxu1 %v469_v15  ;;  %v405_v49 = vld [vmem:[%s746_s6] ss:$0 sm:$0xff]  ;;  %p488_p0 = scmp.ne.s32.totalorder %s356_s17, %s487_s20  ;;  %p493_p2 = scmp.lt.s32.totalorder %s487_s20, %s487_s20 }
   0xc   :  { %433 = vmatmul.mubr.msk.f32.vlgmr.msra.gmra.mrb[0].mxu0 %vm35_vm0, %v44_v19  ;;  %p494_p3 = por %p493_p2, %p492_p1 }
   0xd   :  { %476 = vmatpush3.bf16.msra.mxu0 %v473_v16  ;;  %444 = vmatmul.mubr.msk.f32.vlgmr.msra.gmra.mrb[0].mxu1 %vm35_vm0, %v44_v19 }
   0xe   :  { %478 = vmatprep.subr.bf16.mxu0 %v477_v20  ;;  %454 = vmatprep.mubr.msk.f32.mxu0 %vm35_vm0, %v43_v10  ;;  %v138_v23 = vld [vmem:[#allocation3 + $0x8] sm:$0xff]  ;;  %v137_v25 = vld [vmem:[#allocation3] sm:$0xff]  ;;  %p495_p4 = pnand %p494_p3, %p488_p0 }
   0xf   :  { %v224_v33 = vld [vmem:[#allocation4 + $0x8] sm:$0xff]  ;;  %v223_v34 = vld [vmem:[#allocation4] sm:$0xff] }
  0x11   :  { %480 = vmatpush3.bf16.msra.mxu0 %v477_v20 }
  0x14   :  { %455 = vmatmul.mubr.msk.f32.vlgmr.msra.gmra.mrb[2].mxu0 %vm35_vm0, %v44_v19 }
  0xdf   :  { %v434_v24 = vpop.f32.mrb[0].mxu0 }
  0xe0   :  { %v134_v26 = vadd.f32 %v434_v24, %v46_v21  ;;  %v124_v27 = vpop.f32.mrb[1].mxu0  ;;  %v445_v28 = vpop.f32.mrb[0].mxu1 }
  0xe1   :  { %v133_v29 = vadd.f32 %v124_v27, %v45_v22  ;;  %v219_v30 = vadd.f32 %v445_v28, %v138_v23  ;;  %v209_v31 = vpop.f32.mrb[1].mxu1 }
  0xe2   :  { %136 = vst.msk [vmem:[#allocation2 + $0x8] sm:$0xff] %vm35_vm0, %v134_v26  ;;  %v218_v32 = vadd.f32 %v209_v31, %v137_v25 }
  0xe3   :  { %135 = vst.msk [vmem:[#allocation2] sm:$0xff] %vm35_vm0, %v133_v29 }
  0xe4   :  { %222 = vst.msk [vmem:[#allocation3 + $0x8] sm:$0xff] %vm38_vm1, %v219_v30  ;;  %221 = vst.msk [vmem:[#allocation3] sm:$0xff] %vm38_vm1, %v218_v32 }
  0xe7   :  { %v456_v35 = vpop.f32.mrb[2].mxu0 }
  0xe8   :  { %v305_v37 = vadd.f32 %v456_v35, %v224_v33  ;;  %v295_v38 = vpop.f32.mrb[3].mxu0 }
  0xe9   :  { %v304_v40 = vadd.f32 %v295_v38, %v223_v34  ;;  %v312_v41 = vld [vmem:[#allocation2 + $0x8] sm:$0xff] }
  0xea   :  { %307 = vst.msk [vmem:[#allocation4 + $0x8] sm:$0xff] %vm38_vm1, %v305_v37  ;;  %v311_v43 = vld [vmem:[#allocation2] sm:$0xff]  ;;  %v321_v44 = vadd.f32 %v403_v36, %v312_v41 }
  0xeb   :  { %v325_v42 = vld [vmem:[#allocation3 + $0x8] sm:$0xff]  ;;  %306 = vst.msk [vmem:[#allocation4] sm:$0xff] %vm38_vm1, %v304_v40  ;;  %v324_v45 = vld [vmem:[#allocation3] sm:$0xff]  ;;  %v320_v47 = vadd.f32 %v403_v36, %v311_v43 }
  0xec   :  { %v334_v46 = vadd.f32 %v404_v39, %v325_v42  ;;  %v333_v48 = vadd.f32 %v404_v39, %v324_v45  ;;  %323 = vst.msk [vmem:[#allocation5 + $0x8] sm:$0xff] %vm35_vm0, %v321_v44 }
  0xed   :  { %322 = vst.msk [vmem:[#allocation5] sm:$0xff] %vm35_vm0, %v320_v47 }
  0xee   :  { %336 = vst.msk [vmem:[#allocation7 + $0x8] sm:$0xff] %vm38_vm1, %v334_v46  ;;  %335 = vst.msk [vmem:[#allocation7] sm:$0xff] %vm38_vm1, %v333_v48 }
  0xef   :  { %498 = shalt.err (!%p495_p4)
}
  0xf0   :  { %s499_s1 = scalar_lea.hbm %s747_s7, 256 }
  0xf1   :  { %p500_p5 = scmp.ne.s32.totalorder %s747_s7, %s499_s1  ;;  %p503_p6 = scmp.lt.u32.totalorder %s499_s1, %s747_s7 }
  0xf3   :  { %p505_p7 = pnand %p503_p6, %p500_p5 }
  0xf5   :  { %508 = shalt.err (!%p505_p7)
}
  0xf6   :  { %s560_s6 = smov 128   ;;  %s561_s27 = smov 8  }
  0xf7   :  { %361 = dma.vmem_to_hbm [thread:$0]  %s356_s17, 256, %s747_s7, [#allocation6], %s560_s6, %s560_s6, %s561_s27  }
  0xf8   :  { %s509_s30 = scalar_lea.vmem %s679_s19, 256  ;;  %p514_p9 = scmp.lt.s32.totalorder %s679_s19, %s679_s19 }
  0xf9   :  { %p510_p8 = scmp.ne.s32.totalorder %s679_s19, %s509_s30  ;;  %p515_p10 = scmp.lt.s32.totalorder %s509_s30, %s509_s30 }
  0xfb   :  { %p516_p11 = por %p515_p10, %p514_p9 }
  0xfd   :  { %p517_p12 = pnand %p516_p11, %p510_p8 }
  0xff   :  { %520 = shalt.err (!%p517_p12)
}
 0x100   :  { %s521_s12 = scalar_lea.hbm %s748_s8, 256 }
 0x101   :  { %p522_p13 = scmp.ne.s32.totalorder %s748_s8, %s521_s12  ;;  %p525_p0 = scmp.lt.u32.totalorder %s521_s12, %s748_s8 }
 0x103   :  { %p527_p1 = pnand %p525_p0, %p522_p13 }
 0x105   :  { %530 = shalt.err (!%p527_p1)
}
 0x106   :  { %373 = dma.vmem_to_hbm [thread:$0]  %s679_s19, 256, %s748_s8, [#allocation8], %s560_s6, %s560_s6, %s561_s27   ;;  %v338_v50 = vld [vmem:[#allocation4 + $0x8] sm:$0xff]  ;;  %v337_v51 = vld [vmem:[#allocation4] sm:$0xff] }
 0x107   :  { %s562_s15 = smov [#allocation9]   ;;  %v347_v52 = vadd.f32 %v405_v49, %v338_v50  ;;  %v346_v53 = vadd.f32 %v405_v49, %v337_v51 }
 0x108   :  { %s379_s16 = sshll.u32 %s562_s15, 4  ;;  %s380_s16 = int_to_ptr.vmem [resolvable:$true] %s379_s16 }
 0x109   :  { %349 = vst.msk [vmem:[#allocation9 + $0x8] sm:$0xff] %vm38_vm1, %v347_v52  ;;  %348 = vst.msk [vmem:[#allocation9] sm:$0xff] %vm38_vm1, %v346_v53  ;;  %s531_s17 = scalar_lea.vmem %s380_s16, 256  ;;  %p536_p3 = scmp.lt.s32.totalorder %s380_s16, %s380_s16 }
 0x10a   :  { %p532_p2 = scmp.ne.s32.totalorder %s380_s16, %s531_s17  ;;  %p537_p4 = scmp.lt.s32.totalorder %s531_s17, %s531_s17 }
 0x10c   :  { %p538_p5 = por %p537_p4, %p536_p3 }
 0x10e   :  { %p539_p6 = pnand %p538_p5, %p532_p2 }
 0x110   :  { %542 = shalt.err (!%p539_p6)
}
 0x111   :  { %s543_s19 = scalar_lea.hbm %s749_s9, 256 }
 0x112   :  { %p544_p7 = scmp.ne.s32.totalorder %s749_s9, %s543_s19  ;;  %p547_p8 = scmp.lt.u32.totalorder %s543_s19, %s749_s9 }
 0x114   :  { %p549_p9 = pnand %p547_p8, %p544_p7 }
 0x116   :  { %552 = shalt.err (!%p549_p9)
}
 0x117   :  { %385 = dma.vmem_to_hbm [thread:$0]  %s380_s16, 256, %s749_s9, [#allocation8], %s560_s6, %s560_s6, %s561_s27  }
 0x118   :  { %553 = dma.done.wait [#allocation6], 256  }
 0x119   :  { %554 = vsyncadd [#allocation6], 4294967040 }
 0x11a   :  { %555 = dma.done.wait [#allocation8], 512  }
 0x11b   :  { %556 = vsyncadd [#allocation8], 4294966784 }
 0x11c   :  { %395 = vsyncpa [#allocation6], 1 }
 0x11d   :  { %396 = vsyncpa [#allocation8], 1 }

</bundles_post_ra>
